<compile_context>
chip_gen: v5e
topology: v5e:2x2
jax: 0.10.0
libtpu: 0.0.40
codegen_flags: <defaults>
</compile_context>

<pallas_src>
import functools

import jax
import jax.numpy as jnp
import numpy as np
from jax.experimental import pallas as pl
from jax.experimental.pallas import tpu as pltpu


def _round_up(a, b):
    return ((a + b - 1) // b) * b


def _cdiv(a, b):
    return (a + b - 1) // b


def _vmem_plan():
    """(planning_budget_bytes, vmem_limit_bytes) per TPU generation."""
    try:
        phys = pltpu.get_tpu_info().vmem_capacity_bytes
    except Exception:
        phys = 64 * 1024 * 1024  # conservative: v7x per-TensorCore physical
    vmem_limit = min(phys * 5 // 8, 96 * 1024 * 1024)   # 40 MiB on v7x, 80 MiB on v5e/v6e
    budget = vmem_limit - 8 * 1024 * 1024               # headroom for compiler scratch
    return budget, vmem_limit


# ---------------------------------------------------------------------------
# Stage 1: xw = x @ W   (bf16 MXU, f32 accumulate, bf16 result)
# ---------------------------------------------------------------------------
def _xw_kernel(x_ref, w_ref, xw_ref):
    # W fully resident, no reduction axis, no scratch accumulator.
    xw_ref[...] = jnp.dot(
        x_ref[...].astype(jnp.bfloat16), w_ref[...],
        preferred_element_type=jnp.float32,
    ).astype(xw_ref.dtype)


def _xw_kernel_acc(x_ref, w_ref, xw_ref, acc_ref):
    # Fallback: tiled reduction over input features for very large Fin.
    @pl.when(pl.program_id(1) == 0)
    def _():
        acc_ref[...] = jnp.zeros_like(acc_ref)

    acc_ref[...] += jnp.dot(
        x_ref[...].astype(jnp.bfloat16), w_ref[...],
        preferred_element_type=jnp.float32,
    )

    @pl.when(pl.program_id(1) == pl.num_programs(1) - 1)
    def _():
        xw_ref[...] = acc_ref[...].astype(xw_ref.dtype)


# ---------------------------------------------------------------------------
# Stage 2: out = relu(adj @ xw)   (bf16 MXU, f32 accumulate)
# ---------------------------------------------------------------------------
def _spmm_relu_resident_kernel(adj_ref, xw_ref, out_ref, acc_ref, *, tk):
    # xw is fully resident in VMEM; slice the current reduction block.
    k = pl.program_id(1)

    @pl.when(k == 0)
    def _():
        acc_ref[...] = jnp.zeros_like(acc_ref)

    off = pl.multiple_of(k * tk, tk)
    acc_ref[...] += jnp.dot(
        adj_ref[...].astype(jnp.bfloat16),
        xw_ref[pl.ds(off, tk), :],
        preferred_element_type=jnp.float32,
    )

    @pl.when(k == pl.num_programs(1) - 1)
    def _():
        out_ref[...] = jnp.maximum(acc_ref[...], 0.0).astype(out_ref.dtype)


def _spmm_relu_streamed_kernel(adj_ref, xw_ref, out_ref, acc_ref):
    # Fallback: xw streamed (tk, Fout) per reduction step.
    k = pl.program_id(1)

    @pl.when(k == 0)
    def _():
        acc_ref[...] = jnp.zeros_like(acc_ref)

    acc_ref[...] += jnp.dot(
        adj_ref[...].astype(jnp.bfloat16), xw_ref[...],
        preferred_element_type=jnp.float32,
    )

    @pl.when(k == pl.num_programs(1) - 1)
    def _():
        out_ref[...] = jnp.maximum(acc_ref[...], 0.0).astype(out_ref.dtype)


def graph_conv_sparse(x, weight, adj, *, out_dtype=jnp.float32):
    """relu(adj @ (x @ weight)) — tiled, bf16-MXU, f32-accumulate Pallas kernels."""
    n, fin = x.shape
    fout = weight.shape[1]
    assert adj.shape == (n, n)

    budget, vmem_limit = _vmem_plan()
    adj_bytes = adj.dtype.itemsize
    x_bytes = x.dtype.itemsize
    out_bytes = jnp.dtype(out_dtype).itemsize

    fout_pad = _round_up(max(fout, 128), 128)   # lane-dense output width
    fin_pad = _round_up(max(fin, 128), 128)

    # ---- stage-2 tile sizes (16-row aligned for bf16 sublane packing) -----
    tm = min(512, _round_up(n, 16))             # adj / out row tile
    if _round_up(n, tm) // tm < 2 and n > 256:  # give both v7x TCs row tiles
        tm = max(128, _round_up(_cdiv(n, 2), 16))
    tk = min(1024, _round_up(n, 128))           # adj reduction tile (lane axis)
    n_rows = _round_up(n, tm)
    n_cols = _round_up(n, tk)

    # Resident-xw decision against the per-generation VMEM budget.
    xw_resident_bytes = 2 * n_cols * fout_pad * 2            # double-buffered bf16
    stream_bytes = (2 * tm * tk * adj_bytes                  # adj tiles
                    + 2 * tm * fout_pad * out_bytes          # output tiles
                    + tm * fout_pad * 4)                     # f32 accumulator
    xw_is_resident = (xw_resident_bytes + stream_bytes) <= budget

    # ---- pad only when not tile-aligned (no dtype-cast pass over adj) -----
    x_in = x if (n_cols == n and fin_pad == fin) else jnp.pad(
        x, ((0, n_cols - n), (0, fin_pad - fin)))
    w_in = weight if (fin_pad == fin and fout_pad == fout) else jnp.pad(
        weight, ((0, fin_pad - fin), (0, fout_pad - fout)))
    w_in = w_in.astype(jnp.bfloat16)            # tiny; one-time cast
    adj_in = adj if (n_rows == n and n_cols == n) else jnp.pad(
        adj, ((0, n_rows - n), (0, n_cols - n)))

    # ---- stage 1: xw = x @ W ----------------------------------------------
    tm1 = tk                                    # divides n_cols by construction
    stage1_collapsed = (2 * tm1 * fin_pad * x_bytes
                        + 2 * fin_pad * fout_pad * 2
                        + 2 * tm1 * fout_pad * 2) <= budget

    if stage1_collapsed:
        xw = pl.pallas_call(
            _xw_kernel,
            out_shape=jax.ShapeDtypeStruct((n_cols, fout_pad), jnp.bfloat16),
            grid_spec=pltpu.PrefetchScalarGridSpec(
                num_scalar_prefetch=0,
                grid=(n_cols // tm1,),
                in_specs=[
                    pl.BlockSpec((tm1, fin_pad), lambda i: (i, 0)),
                    pl.BlockSpec((fin_pad, fout_pad), lambda i: (0, 0)),  # W resident
                ],
                out_specs=pl.BlockSpec((tm1, fout_pad), lambda i: (i, 0)),
            ),
            compiler_params=pltpu.CompilerParams(
                dimension_semantics=("parallel",),
                vmem_limit_bytes=vmem_limit,
            ),
            cost_estimate=pl.CostEstimate(
                flops=2 * n_cols * fin_pad * fout_pad,
                transcendentals=0,
                bytes_accessed=(n_cols * fin_pad * x_bytes
                                + fin_pad * fout_pad * 2
                                + n_cols * fout_pad * 2),
            ),
        )(x_in, w_in)
    else:
        kf = min(1024, fin_pad)
        xw = pl.pallas_call(
            _xw_kernel_acc,
            out_shape=jax.ShapeDtypeStruct((n_cols, fout_pad), jnp.bfloat16),
            grid_spec=pltpu.PrefetchScalarGridSpec(
                num_scalar_prefetch=0,
                grid=(n_cols // tm1, fin_pad // kf),
                in_specs=[
                    pl.BlockSpec((tm1, kf), lambda i, k: (i, k)),
                    pl.BlockSpec((kf, fout_pad), lambda i, k: (k, 0)),
                ],
                out_specs=pl.BlockSpec((tm1, fout_pad), lambda i, k: (i, 0)),
                scratch_shapes=[pltpu.VMEM((tm1, fout_pad), jnp.float32)],
            ),
            compiler_params=pltpu.CompilerParams(
                dimension_semantics=("parallel", "arbitrary"),
                vmem_limit_bytes=vmem_limit,
            ),
            cost_estimate=pl.CostEstimate(
                flops=2 * n_cols * fin_pad * fout_pad,
                transcendentals=0,
                bytes_accessed=(n_cols * fin_pad * x_bytes
                                + (n_cols // tm1) * fin_pad * fout_pad * 2
                                + n_cols * fout_pad * 2),
            ),
        )(x_in, w_in)

    # ---- stage 2: out = relu(adj @ xw) --------------------------------------
    if xw_is_resident:
        kernel2 = functools.partial(_spmm_relu_resident_kernel, tk=tk)
        xw_spec = pl.BlockSpec((n_cols, fout_pad), lambda i, k: (0, 0))  # DMA once
        xw_traffic = n_cols * fout_pad * 2
    else:
        kernel2 = _spmm_relu_streamed_kernel
        xw_spec = pl.BlockSpec((tk, fout_pad), lambda i, k: (k, 0))
        xw_traffic = (n_rows // tm) * n_cols * fout_pad * 2   # re-read per row tile

    out_p = pl.pallas_call(
        kernel2,
        out_shape=jax.ShapeDtypeStruct((n_rows, fout_pad), out_dtype),
        grid_spec=pltpu.PrefetchScalarGridSpec(
            num_scalar_prefetch=0,
            grid=(n_rows // tm, n_cols // tk),
            in_specs=[
                pl.BlockSpec((tm, tk), lambda i, k: (i, k)),
                xw_spec,
            ],
            out_specs=pl.BlockSpec((tm, fout_pad), lambda i, k: (i, 0)),
            scratch_shapes=[pltpu.VMEM((tm, fout_pad), jnp.float32)],
        ),
        compiler_params=pltpu.CompilerParams(
            dimension_semantics=("parallel", "arbitrary"),
            vmem_limit_bytes=vmem_limit,
        ),
        cost_estimate=pl.CostEstimate(
            flops=2 * n_rows * n_cols * fout_pad,
            transcendentals=0,
            bytes_accessed=(n_rows * n_cols * adj_bytes
                            + xw_traffic
                            + n_rows * fout_pad * out_bytes),
        ),
    )(adj_in, xw)

    # Strip lane / row padding back off.
    return out_p[:n, :fout]


def glorot_init(key, input_dim, output_dim):
    init_range = np.sqrt(6.0 / (input_dim + output_dim))
    u = jax.random.uniform(key, (input_dim, output_dim), dtype=jnp.float32)
    return u * 2.0 * init_range - init_range


if __name__ == "__main__":
    key = jax.random.PRNGKey(0)
    k_x, k_w, k_adj = jax.random.split(key, 3)

    N, INPUT_DIM, OUTPUT_DIM = 128, 64, 32

    x = jax.random.normal(k_x, (N, INPUT_DIM), dtype=jnp.float32)
    weight = glorot_init(k_w, INPUT_DIM, OUTPUT_DIM)

    # Deterministic symmetric row-normalized "adjacency" (stands in for graph.X).
    a = (jax.random.uniform(k_adj, (N, N)) > 0.9).astype(jnp.float32)
    a = a + a.T + jnp.eye(N, dtype=jnp.float32)
    a = jnp.minimum(a, 1.0)
    adj = a / jnp.sum(a, axis=1, keepdims=True)

    out = graph_conv_sparse(x, weight, adj)
    out = jax.block_until_ready(out)

    # Reference check in plain JAX (f32); tolerance relaxed for bf16 MXU inputs.
    ref = jnp.maximum(adj @ (x @ weight), 0.0)
    assert out.shape == (N, OUTPUT_DIM)
    np.testing.assert_allclose(np.asarray(out), np.asarray(ref), rtol=5e-2, atol=5e-2)

    print("KERNEL_OK")
</pallas_src>

<mosaic_0001>
module attributes {stable_mosaic.version = 11 : i64} {
  func.func @_xw_kernel(%arg0: i32, %arg1: memref<128x128xf32, #tpu.memory_space<vmem>>, %arg2: memref<128x128xbf16, #tpu.memory_space<vmem>>, %arg3: memref<128x128xbf16, #tpu.memory_space<vmem>>) attributes {dimension_semantics = [#tpu.dimension_semantics<parallel>], iteration_bounds = array<i64: 1>, scalar_prefetch = 0 : i64, scratch_operands = 0 : i64, tpu.core_type = #tpu.core_type<tc>, window_params = [{transform_indices = @transform_0, window_bounds = array<i64: 128, 128>}, {pipeline_mode = #tpu.pipeline_mode<synchronous>, transform_indices = @transform_1, window_bounds = array<i64: 128, 128>}, {transform_indices = @transform_2, window_bounds = array<i64: 128, 128>}]} {
    %c0 = arith.constant 0 : index
    %c0_0 = arith.constant 0 : index
    %0 = vector.load %arg1[%c0, %c0_0] : memref<128x128xf32, #tpu.memory_space<vmem>>, vector<128x128xf32>
    %1 = arith.truncf %0 : vector<128x128xf32> to vector<128x128xbf16>
    %c0_1 = arith.constant 0 : index
    %c0_2 = arith.constant 0 : index
    %2 = vector.load %arg2[%c0_1, %c0_2] : memref<128x128xbf16, #tpu.memory_space<vmem>>, vector<128x128xbf16>
    %cst = arith.constant dense<0.000000e+00> : vector<128x128xf32>
    %3 = tpu.matmul %1, %2, %cst {dimension_numbers = #tpu.dot_dimension_numbers<[1], [0], [0], [1], [0, 0, 1, 1], [], []>} : vector<128x128xbf16>, vector<128x128xbf16>, vector<128x128xf32> -> vector<128x128xf32>
    %4 = arith.truncf %3 : vector<128x128xf32> to vector<128x128xbf16>
    %c0_3 = arith.constant 0 : index
    %c0_4 = arith.constant 0 : index
    %5 = vector.load %arg3[%c0_3, %c0_4] : memref<128x128xbf16, #tpu.memory_space<vmem>>, vector<128x128xbf16>
    tpu.vector_store %arg3[%c0_3, %c0_4], %4 {strides = array<i32>} : memref<128x128xbf16, #tpu.memory_space<vmem>>, vector<128x128xbf16>,
    return
  }
  func.func @transform_0(%arg0: i32) -> (i32, i32) {
    %c0_i32 = arith.constant 0 : i32
    %c0_i32_0 = arith.constant 0 : i32
    return %arg0, %c0_i32 : i32, i32
  }
  func.func @transform_1(%arg0: i32) -> (i32, i32) {
    %c0_i32 = arith.constant 0 : i32
    %c0_i32_0 = arith.constant 0 : i32
    %c0_i32_1 = arith.constant 0 : i32
    return %c0_i32, %c0_i32_0 : i32, i32
  }
  func.func @transform_2(%arg0: i32) -> (i32, i32) {
    %c0_i32 = arith.constant 0 : i32
    %c0_i32_0 = arith.constant 0 : i32
    return %arg0, %c0_i32 : i32, i32
  }
}

</mosaic_0001>

<bundles_post_ra>
// kernel: tpu_custom_call.1
= control target key start
LH: loop header
LB: loop body
LE: loop exit
PB: predicated region body
PF: predicated region fallthrough
CT: control target
= control target key end

     0   :  { %7 = vsyncpa [#allocation3], 0  ;;  %s466_s0 = inlined_call_operand.hbm [shape: f32[128,128], index: 0, kind: input, shape index: {}]   ;;  %s467_s1 = inlined_call_operand.hbm [shape: bf16[128,128], index: 1, kind: input, shape index: {}]   ;;  %s468_s2 = inlined_call_operand.hbm [shape: bf16[128,128], index: 2, kind: output, shape index: {}]  }
   0x1   :  { %8 = vsyncpa [#allocation6], 0 }
   0x2   :  { %9 = vsyncpa [#allocation4], 0  ;;  %s14_s11 = sshll.u32 %s466_s0, 4  ;;  %s429_s12 = smov [#allocation2]   ;;  %s15_s11 = int_to_ptr.hbm [resolvable:$true] %s14_s11 }
   0x3   :  { %s16_s13 = sshll.u32 %s429_s12, 4  ;;  %s27_s16 = sshll.u32 %s467_s1, 4  ;;  %s17_s13 = int_to_ptr.vmem [resolvable:$true] %s16_s13  ;;  %s28_s16 = int_to_ptr.hbm [resolvable:$true] %s27_s16 }
   0x4   :  { %s430_s17 = smov 128   ;;  %s431_s18 = smov 8  }
   0x5   :  { %22 = dma.hbm_to_vmem [thread:$0]  %s15_s11, 2048, %s17_s13, [#allocation3], %s430_s17, %s430_s17, %s431_s18  }
   0x6   :  { %s432_s19 = smov [#allocation5]   ;;  %s433_s21 = smov 64  }
   0x7   :  { %s29_s20 = sshll.u32 %s432_s19, 4  ;;  %s434_s22 = smov 4   ;;  %s30_s20 = int_to_ptr.vmem [resolvable:$true] %s29_s20 }
   0x8   :  { %35 = dma.hbm_to_vmem [thread:$0]  %s28_s16, 1024, %s30_s20, [#allocation6], %s433_s21, %s433_s21, %s434_s22  }
   0x9   :  { %423 = dma.done.wait [#allocation3], 2048  }
   0xa   :  { %424 = vsyncadd [#allocation3], 4294965248 }
   0xb   :  { %425 = dma.done.wait [#allocation6], 1024  }
   0xc   :  { %426 = vsyncadd [#allocation6], 4294966272  ;;  %v272_v0 = vld [vmem:[#allocation5 + $0x38] sm:$0xff]  ;;  %v271_v1 = vld [vmem:[#allocation5 + $0x30] sm:$0xff]  ;;  %s435_s0 = smov [#allocation7]   ;;  %s219_s25 = sshll.u32 %s468_s2, 4  ;;  %s220_s25 = int_to_ptr.hbm [resolvable:$true] %s219_s25 }
   0xd   :  { %132 = vmatpush.bf16.msra.mxu0 %v272_v0  ;;  %320 = vmatpush.bf16.msra.mxu1 %v272_v0  ;;  %v270_v2 = vld [vmem:[#allocation5 + $0x28] sm:$0xff]  ;;  %v269_v3 = vld [vmem:[#allocation5 + $0x20] sm:$0xff]  ;;  %v268_v4 = vld [vmem:[#allocation5 + $0x18] sm:$0xff]  ;;  %s217_s1 = sshll.u32 %s435_s0, 4  ;;  %s218_s1 = int_to_ptr.vmem [resolvable:$true] %s217_s1 }
   0xe   :  { %321 = vmatpush.bf16.msra.mxu2 %v272_v0  ;;  %322 = vmatpush.bf16.msra.mxu3 %v272_v0  ;;  %v267_v5 = vld [vmem:[#allocation5 + $0x10] sm:$0xff]  ;;  %v266_v6 = vld [vmem:[#allocation5 + $0x8] sm:$0xff]  ;;  %v265_v7 = vld [vmem:[#allocation5] sm:$0xff] }
   0xf   :  { %v44_v8 = vld [vmem:[#allocation2] sm:$0xff]  ;;  %v45_v9 = vld [vmem:[#allocation2 + $0x8] sm:$0xff]  ;;  %v46_v20 = vld [vmem:[#allocation2 + $0x10] sm:$0xff] }
  0x10   :  { %v48_v10 = vld [vmem:[#allocation2 + $0x20] sm:$0xff]  ;;  %v49_v11 = vld [vmem:[#allocation2 + $0x28] sm:$0xff]  ;;  %v60_v16 = vpack.c.bf16 %v45_v9, %v44_v8  ;;  %v47_v21 = vld [vmem:[#allocation2 + $0x18] sm:$0xff] }
  0x11   :  { %133 = vmatpush.bf16.msra.mxu0 %v271_v1  ;;  %323 = vmatpush.bf16.msra.mxu1 %v271_v1  ;;  %v52_v12 = vld [vmem:[#allocation2 + $0x40] sm:$0xff]  ;;  %v53_v13 = vld [vmem:[#allocation2 + $0x48] sm:$0xff]  ;;  %v62_v17 = vpack.c.bf16 %v49_v11, %v48_v10  ;;  %v50_v22 = vld [vmem:[#allocation2 + $0x30] sm:$0xff]  ;;  %v61_v28 = vpack.c.bf16 %v47_v21, %v46_v20 }
  0x12   :  { %324 = vmatpush.bf16.msra.mxu2 %v271_v1  ;;  %325 = vmatpush.bf16.msra.mxu3 %v271_v1  ;;  %v56_v14 = vld [vmem:[#allocation2 + $0x60] sm:$0xff]  ;;  %v57_v15 = vld [vmem:[#allocation2 + $0x68] sm:$0xff]  ;;  %v64_v18 = vpack.c.bf16 %v53_v13, %v52_v12  ;;  %v51_v23 = vld [vmem:[#allocation2 + $0x38] sm:$0xff] }
  0x13   :  { %v66_v19 = vpack.c.bf16 %v57_v15, %v56_v14  ;;  %v54_v24 = vld [vmem:[#allocation2 + $0x50] sm:$0xff]  ;;  %v55_v25 = vld [vmem:[#allocation2 + $0x58] sm:$0xff]  ;;  %v63_v29 = vpack.c.bf16 %v51_v23, %v50_v22 }
  0x14   :  { %v58_v26 = vld [vmem:[#allocation2 + $0x70] sm:$0xff]  ;;  %v59_v27 = vld [vmem:[#allocation2 + $0x78] sm:$0xff]  ;;  %v65_v30 = vpack.c.bf16 %v55_v25, %v54_v24 }
  0x15   :  { %134 = vmatpush.bf16.msra.mxu0 %v270_v2  ;;  %326 = vmatpush.bf16.msra.mxu1 %v270_v2  ;;  %v67_v31 = vpack.c.bf16 %v59_v27, %v58_v26 }
  0x16   :  { %327 = vmatpush.bf16.msra.mxu2 %v270_v2  ;;  %328 = vmatpush.bf16.msra.mxu3 %v270_v2 }
  0x19   :  { %135 = vmatpush.bf16.msra.mxu0 %v269_v3  ;;  %329 = vmatpush.bf16.msra.mxu1 %v269_v3 }
  0x1a   :  { %330 = vmatpush.bf16.msra.mxu2 %v269_v3  ;;  %331 = vmatpush.bf16.msra.mxu3 %v269_v3 }
  0x1d   :  { %136 = vmatpush.bf16.msra.mxu0 %v268_v4  ;;  %332 = vmatpush.bf16.msra.mxu1 %v268_v4 }
  0x1e   :  { %333 = vmatpush.bf16.msra.mxu2 %v268_v4  ;;  %334 = vmatpush.bf16.msra.mxu3 %v268_v4 }
  0x21   :  { %137 = vmatpush.bf16.msra.mxu0 %v267_v5  ;;  %335 = vmatpush.bf16.msra.mxu1 %v267_v5 }
  0x22   :  { %336 = vmatpush.bf16.msra.mxu2 %v267_v5  ;;  %337 = vmatpush.bf16.msra.mxu3 %v267_v5 }
  0x25   :  { %138 = vmatpush.bf16.msra.mxu0 %v266_v6  ;;  %338 = vmatpush.bf16.msra.mxu1 %v266_v6 }
  0x26   :  { %339 = vmatpush.bf16.msra.mxu2 %v266_v6  ;;  %340 = vmatpush.bf16.msra.mxu3 %v266_v6 }
  0x29   :  { %139 = vmatpush.bf16.msra.mxu0 %v265_v7  ;;  %341 = vmatpush.bf16.msra.mxu1 %v265_v7 }
  0x2a   :  { %342 = vmatpush.bf16.msra.mxu2 %v265_v7  ;;  %343 = vmatpush.bf16.msra.mxu3 %v265_v7 }
  0x2c   :  { %140 = vmatmul.bf16.vlgmr.msra.gmra.mxu0 %v60_v16  ;;  %150 = vmatmul.bf16.vlgmr.msra.gmra.mxu1 %v62_v17 }
  0x2d   :  { %160 = vmatmul.bf16.vlgmr.msra.gmra.mxu2 %v64_v18  ;;  %170 = vmatmul.bf16.vlgmr.msra.gmra.mxu3 %v66_v19 }
  0x3c   :  { %145 = vmatmul.bf16.gmra.mxu0 %v61_v28  ;;  %155 = vmatmul.bf16.gmra.mxu1 %v63_v29 }
  0x3d   :  { %165 = vmatmul.bf16.gmra.mxu2 %v65_v30  ;;  %175 = vmatmul.bf16.gmra.mxu3 %v67_v31 }
  0xa9   :  { %v141_v32 = vpop.f32.mrf.mxu0  ;;  %v151_v33 = vpop.f32.mrf.mxu1 }
  0xb0   :  { %v161_v34 = vpop.f32.mrf.mxu2  ;;  %v171_v35 = vpop.f32.mrf.mxu3 }
  0xb1   :  { %v143_v36 = vpop.f32.mrf.mxu0  ;;  %v153_v37 = vpop.f32.mrf.mxu1 }
  0xb2   :  { %v276_v38 = vpack.c.bf16 %v143_v36, %v141_v32  ;;  %v286_v39 = vpack.c.bf16 %v153_v37, %v151_v33 }
  0xb4   :  { %277 = vst [vmem:[#allocation7] sm:$0xff] %v276_v38  }
  0xb5   :  { %314 = vst [vmem:[#allocation7 + $0x10] sm:$0xff] %v286_v39  }
  0xb8   :  { %v163_v40 = vpop.f32.mrf.mxu2  ;;  %v173_v41 = vpop.f32.mrf.mxu3 }
  0xb9   :  { %v296_v42 = vpack.c.bf16 %v163_v40, %v161_v34  ;;  %v306_v43 = vpack.c.bf16 %v173_v41, %v171_v35  ;;  %v146_v44 = vpop.f32.mrf.mxu0  ;;  %v156_v45 = vpop.f32.mrf.mxu1 }
  0xbb   :  { %316 = vst [vmem:[#allocation7 + $0x20] sm:$0xff] %v296_v42  }
  0xbc   :  { %318 = vst [vmem:[#allocation7 + $0x30] sm:$0xff] %v306_v43  }
  0xc0   :  { %v166_v46 = vpop.f32.mrf.mxu2  ;;  %v176_v47 = vpop.f32.mrf.mxu3 }
  0xc1   :  { %v148_v48 = vpop.f32.mrf.mxu0  ;;  %v158_v49 = vpop.f32.mrf.mxu1 }
  0xc2   :  { %v281_v50 = vpack.c.bf16 %v148_v48, %v146_v44  ;;  %v291_v51 = vpack.c.bf16 %v158_v49, %v156_v45 }
  0xc4   :  { %313 = vst [vmem:[#allocation7 + $0x8] sm:$0xff] %v281_v50  }
  0xc5   :  { %315 = vst [vmem:[#allocation7 + $0x18] sm:$0xff] %v291_v51  }
  0xc8   :  { %v168_v52 = vpop.f32.mrf.mxu2  ;;  %v178_v53 = vpop.f32.mrf.mxu3 }
  0xc9   :  { %v301_v54 = vpack.c.bf16 %v168_v52, %v166_v46  ;;  %v311_v55 = vpack.c.bf16 %v178_v53, %v176_v47 }
  0xcb   :  { %317 = vst [vmem:[#allocation7 + $0x28] sm:$0xff] %v301_v54  }
  0xcc   :  { %319 = vst [vmem:[#allocation7 + $0x38] sm:$0xff] %v311_v55  }
  0xcd   :  { %225 = dma.vmem_to_hbm [thread:$0]  %s218_s1, 1024, %s220_s25, [#allocation4], %s433_s21, %s433_s21, %s434_s22  }
  0xce   :  { %427 = dma.done.wait [#allocation4], 1024  }
  0xcf   :  { %428 = vsyncadd [#allocation4], 4294966272 }
  0xd0   :  { %230 = vsyncpa [#allocation3], 1 }
  0xd1   :  { %231 = vsyncpa [#allocation6], 1 }
  0xd2   :  { %232 = vsyncpa [#allocation4], 1 }

</bundles_post_ra>
